<compile_context>
chip_gen: v7x
topology: tpu7x:2x2x1
jax: 0.10.0
libtpu: 0.0.40
codegen_flags: <defaults>
</compile_context>

<pallas_src>
import functools

import jax
import jax.numpy as jnp
from jax.experimental import pallas as pl
from jax.experimental.pallas import tpu as pltpu

_LANE = 128
_SMOOTH = 1e-8
_A = 0.3
_B = 0.4


def _tversky_partial_kernel(x_ref, y_ref, tp_ref, sx_ref, ct_ref, *,
                            num_classes, sblk, s_total, blocks_per_group):
    # x_ref : (1, C, SBLK)  predictions block (f32 or bf16)
    # y_ref : (1, 1, SBLK)  integer class-id labels block
    # tp/sx/ct_ref : (1, 1, C, 1) f32 partial sums, VMEM-resident across the
    #                innermost ('arbitrary') spatial axis of the grid.
    g = pl.program_id(1)
    s = pl.program_id(2)

    @pl.when(s == 0)
    def _():
        tp_ref[...] = jnp.zeros_like(tp_ref)
        sx_ref[...] = jnp.zeros_like(sx_ref)
        ct_ref[...] = jnp.zeros_like(ct_ref)

    # Conceptual global offset of this block.  The DMA block index is clamped
    # in the index_map, so a (rare) fully past-the-end step still reads an
    # in-bounds block; the mask below zeroes its contribution.
    offset = (g * blocks_per_group + s) * sblk

    x = x_ref[0].astype(jnp.float32)   # (C, SBLK); widen bf16 -> f32 in-kernel
    y = y_ref[0].astype(jnp.int32)     # (1, SBLK); widen int8/… -> i32 in-kernel

    def accumulate(xv, yv):
        # Vectorized over classes: onehot via a 2-D iota compare, then three
        # lane-axis reductions.  Labels outside [0, C) only contribute to
        # sum_x (PyTorch's scatter_ would instead raise) — documented quirk.
        cls = jax.lax.broadcasted_iota(jnp.int32, (num_classes, sblk), 0)
        onehot = yv == cls                                           # (C, SBLK)
        tp = jnp.sum(jnp.where(onehot, xv, 0.0), axis=-1, keepdims=True)  # (C,1)
        sx = jnp.sum(xv, axis=-1, keepdims=True)                          # (C,1)
        ct = jnp.sum(jnp.where(onehot, 1.0, 0.0), axis=-1, keepdims=True) # (C,1)
        tp_ref[0, 0] += tp
        sx_ref[0, 0] += sx
        ct_ref[0, 0] += ct

    is_full = offset + sblk <= s_total

    @pl.when(is_full)
    def _():
        # Common case: whole block in range, zero masking overhead.
        accumulate(x, y)

    @pl.when(jnp.logical_not(is_full))
    def _():
        # Ragged tail (or fully past-the-end) block: mask invalid voxels.
        lane = jax.lax.broadcasted_iota(jnp.int32, (1, sblk), 1)
        valid = (lane + offset) < s_total                            # (1, SBLK)
        accumulate(jnp.where(valid, x, 0.0),
                   jnp.where(valid, y, num_classes))   # sentinel class id


def tversky_dice_loss(x, y, *, block_lanes=1024, num_spatial_groups=2):
    """x: [B, C, D, H, W] float predictions (f32 or bf16); y: [B, D, H, W] ints.

    Matches TverskyDiceLoss(apply_nonlin=None, batch_dice=False, do_bg=True,
    loss_mask=None).forward for the W < 32 (non-pooled) branch.
    """
    B, C, D, H, W = x.shape
    assert y.shape == (B, D, H, W)
    assert jnp.issubdtype(y.dtype, jnp.integer)
    assert block_lanes % _LANE == 0
    if W >= 32:
        # TODO(synk): region branch (AdaptiveAvgPool3d to (8,8,8) + /512) of the
        # PyTorch forward is not implemented.
        raise NotImplementedError("region-pooled branch (W >= 32) not implemented")

    S = D * H * W
    xf = x.reshape(B, C, S)          # free reshapes: no padding, no extra HBM pass
    yf = y.reshape(B, 1, S)

    sblk = min(block_lanes, pl.cdiv(S, _LANE) * _LANE)   # lanes per spatial block
    ns = pl.cdiv(S, sblk)                                # spatial blocks total
    groups = max(1, min(num_spatial_groups, ns))         # parallel spatial groups
    nsg = pl.cdiv(ns, groups)                            # blocks per group

    def data_map(b, g, s):
        # Clamp so a fully past-the-end step (groups not dividing ns) still
        # DMAs in-bounds data; the kernel masks its contribution to zero.
        return (b, 0, jnp.minimum(g * nsg + s, ns - 1))

    def out_map(b, g, s):
        return (b, g, 0, 0)          # constant across s -> VMEM-resident accumulator

    kernel = functools.partial(
        _tversky_partial_kernel, num_classes=C, sblk=sblk, s_total=S,
        blocks_per_group=nsg)

    part_shape = jax.ShapeDtypeStruct((B, groups, C, 1), jnp.float32)
    # VMEM/step: double-buffered C*sblk*4 B for x (+ sblk*4 B for y) ≈ tens of
    # KiB — far below the scoped limit on v5e/v6e/v7x.  If extended to larger /
    # pooled volumes, keep sblk modest and add more 'arbitrary' steps instead
    # of growing the block (v7x has only 64 MiB physical VMEM).
    tp_p, sx_p, ct_p = pl.pallas_call(
        kernel,
        out_shape=(part_shape, part_shape, part_shape),
        grid=(B, groups, nsg),
        in_specs=[
            pl.BlockSpec((1, C, sblk), data_map),
            pl.BlockSpec((1, 1, sblk), data_map),
        ],
        out_specs=(
            pl.BlockSpec((1, 1, C, 1), out_map),
            pl.BlockSpec((1, 1, C, 1), out_map),
            pl.BlockSpec((1, 1, C, 1), out_map),
        ),
        compiler_params=pltpu.CompilerParams(
            dimension_semantics=("parallel", "parallel", "arbitrary")),
    )(xf, yf)

    # Tiny per-class epilogue on (B, C) scalars; fuses with the final mean.
    vol = float(W) ** 3              # PyTorch uses pow(shp_x[-1], 3) — kept as-is
    tp = jnp.sum(tp_p, axis=1)[..., 0] / vol     # (B, C)
    sum_x = jnp.sum(sx_p, axis=1)[..., 0] / vol
    cnt = jnp.sum(ct_p, axis=1)[..., 0] / vol
    fp = sum_x - tp
    fn = cnt - tp
    denom = fp + fn + _SMOOTH
    adaptive_a = _A + _B * (fp + _SMOOTH) / denom
    adaptive_b = _A + _B * (fn + _SMOOTH) / denom
    dc = (tp + _SMOOTH) / (tp + adaptive_a * fp + adaptive_b * fn + _SMOOTH)
    # batch_dice=False default: mean over (B, C), then negate (matches PyTorch).
    return -jnp.mean(dc)


def _reference_loss(x, y):
    """Pure-JAX reference of the same branch, for the correctness check."""
    B, C = x.shape[:2]
    onehot = jax.nn.one_hot(y, C, axis=1, dtype=jnp.float32)
    vol = x.shape[-1] ** 3
    tp = jnp.sum(x * onehot, axis=(2, 3, 4)) / vol
    fp = jnp.sum(x * (1.0 - onehot), axis=(2, 3, 4)) / vol
    fn = jnp.sum((1.0 - x) * onehot, axis=(2, 3, 4)) / vol
    a = _A + _B * ((fp + _SMOOTH) / (fp + fn + _SMOOTH))
    b = _A + _B * ((fn + _SMOOTH) / (fp + fn + _SMOOTH))
    dc = (tp + _SMOOTH) / (tp + a * fp + b * fn + _SMOOTH)
    return -jnp.mean(dc)


if __name__ == "__main__":
    key = jax.random.PRNGKey(0)
    kx1, ky1, kx2, ky2 = jax.random.split(key, 4)

    # Case 1: cubic, lane-aligned volume, B=2.
    B, C, D, H, W = 2, 4, 16, 16, 16
    # apply_nonlin=None in the module: probabilities are produced outside it.
    x1 = jax.nn.softmax(
        jax.random.normal(kx1, (B, C, D, H, W), dtype=jnp.float32), axis=1)
    y1 = jax.random.randint(ky1, (B, D, H, W), 0, C, dtype=jnp.int32)
    loss1 = jax.block_until_ready(tversky_dice_loss(x1, y1))
    ref1 = jax.block_until_ready(_reference_loss(x1, y1))
    assert jnp.abs(loss1 - ref1) < 1e-4, (loss1, ref1)

    # Case 2: B=1 (megacore parallelism comes from the spatial-group axis),
    # non-cubic, non-128-multiple volume (ragged tail masked in-kernel; W^3
    # divisor quirk preserved).
    B2, C2, D2, H2, W2 = 1, 3, 12, 10, 14
    x2 = jax.nn.softmax(
        jax.random.normal(kx2, (B2, C2, D2, H2, W2), dtype=jnp.float32), axis=1)
    y2 = jax.random.randint(ky2, (B2, D2, H2, W2), 0, C2, dtype=jnp.int32)
    loss2 = jax.block_until_ready(tversky_dice_loss(x2, y2))
    ref2 = jax.block_until_ready(_reference_loss(x2, y2))
    assert jnp.abs(loss2 - ref2) < 1e-4, (loss2, ref2)

    # Case 3: x arrives already as bf16 from the producer (halves x HBM DMA);
    # kernel widens per block, accumulates in f32.  Reference uses the same
    # quantized values, so only the reduction order differs.
    x3 = x1.astype(jnp.bfloat16)
    loss3 = jax.block_until_ready(tversky_dice_loss(x3, y1))
    ref3 = jax.block_until_ready(_reference_loss(x3.astype(jnp.float32), y1))
    assert jnp.abs(loss3 - ref3) < 1e-3, (loss3, ref3)

    print("KERNEL_OK")
</pallas_src>

<mosaic_0001>
module attributes {stable_mosaic.version = 11 : i64} {
  func.func @_tversky_partial_kernel(%arg0: i32, %arg1: i32, %arg2: i32, %arg3: memref<1x4x1024xf32, #tpu.memory_space<vmem>>, %arg4: memref<1x1x1024xi32, #tpu.memory_space<vmem>>, %arg5: memref<1x1x4x1xf32, #tpu.memory_space<vmem>>, %arg6: memref<1x1x4x1xf32, #tpu.memory_space<vmem>>, %arg7: memref<1x1x4x1xf32, #tpu.memory_space<vmem>>) attributes {dimension_semantics = [#tpu.dimension_semantics<parallel>, #tpu.dimension_semantics<parallel>, #tpu.dimension_semantics<arbitrary>], iteration_bounds = array<i64: 2, 2, 2>, scalar_prefetch = 0 : i64, scratch_operands = 0 : i64, tpu.core_type = #tpu.core_type<tc>, window_params = [{transform_indices = @transform_0, window_bounds = array<i64: 1, 4, 1024>}, {transform_indices = @transform_1, window_bounds = array<i64: 1, 1, 1024>}, {transform_indices = @transform_2, window_bounds = array<i64: 1, 1, 4, 1>}, {transform_indices = @transform_3, window_bounds = array<i64: 1, 1, 4, 1>}, {transform_indices = @transform_4, window_bounds = array<i64: 1, 1, 4, 1>}]} {
    %c0_i32 = arith.constant 0 : i32
    %0 = arith.cmpi eq, %arg2, %c0_i32 : i32
    %1 = arith.extui %0 : i1 to i32
    %c0_i32_0 = arith.constant 0 : i32
    %2 = arith.cmpi ne, %1, %c0_i32_0 : i32
    scf.if %2 {
      %cst = arith.constant 0.000000e+00 : f32
      %17 = vector.broadcast %cst : f32 to vector<1x1x4x1xf32>
      %c0_9 = arith.constant 0 : index
      %c0_10 = arith.constant 0 : index
      %c0_11 = arith.constant 0 : index
      %c0_12 = arith.constant 0 : index
      %18 = vector.load %arg5[%c0_9, %c0_10, %c0_11, %c0_12] : memref<1x1x4x1xf32, #tpu.memory_space<vmem>>, vector<1x1x4x1xf32>
      tpu.vector_store %arg5[%c0_9, %c0_10, %c0_11, %c0_12], %17 {strides = array<i32>} : memref<1x1x4x1xf32, #tpu.memory_space<vmem>>, vector<1x1x4x1xf32>,
      %cst_13 = arith.constant 0.000000e+00 : f32
      %19 = vector.broadcast %cst_13 : f32 to vector<1x1x4x1xf32>
      %c0_14 = arith.constant 0 : index
      %c0_15 = arith.constant 0 : index
      %c0_16 = arith.constant 0 : index
      %c0_17 = arith.constant 0 : index
      %20 = vector.load %arg6[%c0_14, %c0_15, %c0_16, %c0_17] : memref<1x1x4x1xf32, #tpu.memory_space<vmem>>, vector<1x1x4x1xf32>
      tpu.vector_store %arg6[%c0_14, %c0_15, %c0_16, %c0_17], %19 {strides = array<i32>} : memref<1x1x4x1xf32, #tpu.memory_space<vmem>>, vector<1x1x4x1xf32>,
      %cst_18 = arith.constant 0.000000e+00 : f32
      %21 = vector.broadcast %cst_18 : f32 to vector<1x1x4x1xf32>
      %c0_19 = arith.constant 0 : index
      %c0_20 = arith.constant 0 : index
      %c0_21 = arith.constant 0 : index
      %c0_22 = arith.constant 0 : index
      %22 = vector.load %arg7[%c0_19, %c0_20, %c0_21, %c0_22] : memref<1x1x4x1xf32, #tpu.memory_space<vmem>>, vector<1x1x4x1xf32>
      tpu.vector_store %arg7[%c0_19, %c0_20, %c0_21, %c0_22], %21 {strides = array<i32>} : memref<1x1x4x1xf32, #tpu.memory_space<vmem>>, vector<1x1x4x1xf32>,
    } else {
    }
    %c2_i32 = arith.constant 2 : i32
    %3 = arith.muli %arg1, %c2_i32 : i32
    %4 = arith.addi %3, %arg2 : i32
    %c1024_i32 = arith.constant 1024 : i32
    %5 = arith.muli %4, %c1024_i32 : i32
    %c0 = arith.constant 0 : index
    %c0_1 = arith.constant 0 : index
    %c0_2 = arith.constant 0 : index
    %6 = vector.load %arg3[%c0, %c0_1, %c0_2] : memref<1x4x1024xf32, #tpu.memory_space<vmem>>, vector<1x4x1024xf32>
    %7 = vector.shape_cast %6 : vector<1x4x1024xf32> to vector<4x1024xf32>
    %c0_3 = arith.constant 0 : index
    %c0_4 = arith.constant 0 : index
    %c0_5 = arith.constant 0 : index
    %8 = vector.load %arg4[%c0_3, %c0_4, %c0_5] : memref<1x1x1024xi32, #tpu.memory_space<vmem>>, vector<1x1x1024xi32>
    %9 = vector.shape_cast %8 : vector<1x1x1024xi32> to vector<1x1024xi32>
    %c1024_i32_6 = arith.constant 1024 : i32
    %10 = arith.addi %5, %c1024_i32_6 : i32
    %c4096_i32 = arith.constant 4096 : i32
    %11 = arith.cmpi sle, %10, %c4096_i32 : i32
    %12 = arith.extui %11 : i1 to i32
    %c0_i32_7 = arith.constant 0 : i32
    %13 = arith.cmpi ne, %12, %c0_i32_7 : i32
    scf.if %13 {
      %17 = tpu.iota {dimensions = array<i32: 0>} : vector<4x1024xi32>
      %18 = vector.broadcast %9 : vector<1x1024xi32> to vector<4x1024xi32>
      %19 = arith.cmpi eq, %18, %17 : vector<4x1024xi32>
      %cst = arith.constant 0.000000e+00 : f32
      %20 = vector.broadcast %cst : f32 to vector<4x1024xf32>
      %21 = arith.select %19, %7, %20 : vector<4x1024xi1>, vector<4x1024xf32>
      %cst_9 = arith.constant dense<0.000000e+00> : vector<4xf32>
      %22 = vector.multi_reduction <add>, %21, %cst_9 [1] : vector<4x1024xf32> to vector<4xf32>
      %23 = vector.shape_cast %22 : vector<4xf32> to vector<4x1xf32>
      %cst_10 = arith.constant dense<0.000000e+00> : vector<4xf32>
      %24 = vector.multi_reduction <add>, %7, %cst_10 [1] : vector<4x1024xf32> to vector<4xf32>
      %25 = vector.shape_cast %24 : vector<4xf32> to vector<4x1xf32>
      %cst_11 = arith.constant 1.000000e+00 : f32
      %cst_12 = arith.constant 0.000000e+00 : f32
      %26 = vector.broadcast %cst_11 : f32 to vector<4x1024xf32>
      %27 = vector.broadcast %cst_12 : f32 to vector<4x1024xf32>
      %28 = arith.select %19, %26, %27 : vector<4x1024xi1>, vector<4x1024xf32>
      %cst_13 = arith.constant dense<0.000000e+00> : vector<4xf32>
      %29 = vector.multi_reduction <add>, %28, %cst_13 [1] : vector<4x1024xf32> to vector<4xf32>
      %30 = vector.shape_cast %29 : vector<4xf32> to vector<4x1xf32>
      %c0_14 = arith.constant 0 : index
      %c0_15 = arith.constant 0 : index
      %c0_16 = arith.constant 0 : index
      %c0_17 = arith.constant 0 : index
      %31 = vector.load %arg5[%c0_14, %c0_15, %c0_16, %c0_17] : memref<1x1x4x1xf32, #tpu.memory_space<vmem>>, vector<1x1x4x1xf32>
      %32 = vector.shape_cast %31 : vector<1x1x4x1xf32> to vector<4x1xf32>
      %33 = arith.addf %32, %23 : vector<4x1xf32>
      %c0_18 = arith.constant 0 : index
      %c0_19 = arith.constant 0 : index
      %c0_20 = arith.constant 0 : index
      %c0_21 = arith.constant 0 : index
      %34 = vector.load %arg5[%c0_18, %c0_19, %c0_20, %c0_21] : memref<1x1x4x1xf32, #tpu.memory_space<vmem>>, vector<1x1x4x1xf32>
      %35 = vector.shape_cast %34 : vector<1x1x4x1xf32> to vector<4x1xf32>
      %36 = vector.shape_cast %33 : vector<4x1xf32> to vector<1x1x4x1xf32>
      tpu.vector_store %arg5[%c0_18, %c0_19, %c0_20, %c0_21], %36 {strides = array<i32>} : memref<1x1x4x1xf32, #tpu.memory_space<vmem>>, vector<1x1x4x1xf32>,
      %c0_22 = arith.constant 0 : index
      %c0_23 = arith.constant 0 : index
      %c0_24 = arith.constant 0 : index
      %c0_25 = arith.constant 0 : index
      %37 = vector.load %arg6[%c0_22, %c0_23, %c0_24, %c0_25] : memref<1x1x4x1xf32, #tpu.memory_space<vmem>>, vector<1x1x4x1xf32>
      %38 = vector.shape_cast %37 : vector<1x1x4x1xf32> to vector<4x1xf32>
      %39 = arith.addf %38, %25 : vector<4x1xf32>
      %c0_26 = arith.constant 0 : index
      %c0_27 = arith.constant 0 : index
      %c0_28 = arith.constant 0 : index
      %c0_29 = arith.constant 0 : index
      %40 = vector.load %arg6[%c0_26, %c0_27, %c0_28, %c0_29] : memref<1x1x4x1xf32, #tpu.memory_space<vmem>>, vector<1x1x4x1xf32>
      %41 = vector.shape_cast %40 : vector<1x1x4x1xf32> to vector<4x1xf32>
      %42 = vector.shape_cast %39 : vector<4x1xf32> to vector<1x1x4x1xf32>
      tpu.vector_store %arg6[%c0_26, %c0_27, %c0_28, %c0_29], %42 {strides = array<i32>} : memref<1x1x4x1xf32, #tpu.memory_space<vmem>>, vector<1x1x4x1xf32>,
      %c0_30 = arith.constant 0 : index
      %c0_31 = arith.constant 0 : index
      %c0_32 = arith.constant 0 : index
      %c0_33 = arith.constant 0 : index
      %43 = vector.load %arg7[%c0_30, %c0_31, %c0_32, %c0_33] : memref<1x1x4x1xf32, #tpu.memory_space<vmem>>, vector<1x1x4x1xf32>
      %44 = vector.shape_cast %43 : vector<1x1x4x1xf32> to vector<4x1xf32>
      %45 = arith.addf %44, %30 : vector<4x1xf32>
      %c0_34 = arith.constant 0 : index
      %c0_35 = arith.constant 0 : index
      %c0_36 = arith.constant 0 : index
      %c0_37 = arith.constant 0 : index
      %46 = vector.load %arg7[%c0_34, %c0_35, %c0_36, %c0_37] : memref<1x1x4x1xf32, #tpu.memory_space<vmem>>, vector<1x1x4x1xf32>
      %47 = vector.shape_cast %46 : vector<1x1x4x1xf32> to vector<4x1xf32>
      %48 = vector.shape_cast %45 : vector<4x1xf32> to vector<1x1x4x1xf32>
      tpu.vector_store %arg7[%c0_34, %c0_35, %c0_36, %c0_37], %48 {strides = array<i32>} : memref<1x1x4x1xf32, #tpu.memory_space<vmem>>, vector<1x1x4x1xf32>,
    } else {
    }
    %true = arith.constant true
    %14 = arith.xori %11, %true : i1
    %15 = arith.extui %14 : i1 to i32
    %c0_i32_8 = arith.constant 0 : i32
    %16 = arith.cmpi ne, %15, %c0_i32_8 : i32
    scf.if %16 {
      %17 = tpu.iota {dimensions = array<i32: 1>} : vector<1x1024xi32>
      %18 = vector.broadcast %5 : i32 to vector<1x1024xi32>
      %19 = arith.addi %17, %18 : vector<1x1024xi32>
      %c4096_i32_9 = arith.constant 4096 : i32
      %20 = vector.broadcast %c4096_i32_9 : i32 to vector<1x1024xi32>
      %21 = arith.cmpi slt, %19, %20 : vector<1x1024xi32>
      %cst = arith.constant 0.000000e+00 : f32
      %22 = vector.shape_cast %21 : vector<1x1024xi1> to vector<1x1024xi1>
      %23 = vector.broadcast %22 : vector<1x1024xi1> to vector<4x1024xi1>
      %24 = vector.broadcast %cst : f32 to vector<4x1024xf32>
      %25 = arith.select %23, %7, %24 : vector<4x1024xi1>, vector<4x1024xf32>
      %c4_i32 = arith.constant 4 : i32
      %26 = vector.broadcast %c4_i32 : i32 to vector<1x1024xi32>
      %27 = arith.select %21, %9, %26 : vector<1x1024xi1>, vector<1x1024xi32>
      %28 = tpu.iota {dimensions = array<i32: 0>} : vector<4x1024xi32>
      %29 = vector.broadcast %27 : vector<1x1024xi32> to vector<4x1024xi32>
      %30 = arith.cmpi eq, %29, %28 : vector<4x1024xi32>
      %cst_10 = arith.constant 0.000000e+00 : f32
      %31 = vector.broadcast %cst_10 : f32 to vector<4x1024xf32>
      %32 = arith.select %30, %25, %31 : vector<4x1024xi1>, vector<4x1024xf32>
      %cst_11 = arith.constant dense<0.000000e+00> : vector<4xf32>
      %33 = vector.multi_reduction <add>, %32, %cst_11 [1] : vector<4x1024xf32> to vector<4xf32>
      %34 = vector.shape_cast %33 : vector<4xf32> to vector<4x1xf32>
      %cst_12 = arith.constant dense<0.000000e+00> : vector<4xf32>
      %35 = vector.multi_reduction <add>, %25, %cst_12 [1] : vector<4x1024xf32> to vector<4xf32>
      %36 = vector.shape_cast %35 : vector<4xf32> to vector<4x1xf32>
      %cst_13 = arith.constant 1.000000e+00 : f32
      %cst_14 = arith.constant 0.000000e+00 : f32
      %37 = vector.broadcast %cst_13 : f32 to vector<4x1024xf32>
      %38 = vector.broadcast %cst_14 : f32 to vector<4x1024xf32>
      %39 = arith.select %30, %37, %38 : vector<4x1024xi1>, vector<4x1024xf32>
      %cst_15 = arith.constant dense<0.000000e+00> : vector<4xf32>
      %40 = vector.multi_reduction <add>, %39, %cst_15 [1] : vector<4x1024xf32> to vector<4xf32>
      %41 = vector.shape_cast %40 : vector<4xf32> to vector<4x1xf32>
      %c0_16 = arith.constant 0 : index
      %c0_17 = arith.constant 0 : index
      %c0_18 = arith.constant 0 : index
      %c0_19 = arith.constant 0 : index
      %42 = vector.load %arg5[%c0_16, %c0_17, %c0_18, %c0_19] : memref<1x1x4x1xf32, #tpu.memory_space<vmem>>, vector<1x1x4x1xf32>
      %43 = vector.shape_cast %42 : vector<1x1x4x1xf32> to vector<4x1xf32>
      %44 = arith.addf %43, %34 : vector<4x1xf32>
      %c0_20 = arith.constant 0 : index
      %c0_21 = arith.constant 0 : index
      %c0_22 = arith.constant 0 : index
      %c0_23 = arith.constant 0 : index
      %45 = vector.load %arg5[%c0_20, %c0_21, %c0_22, %c0_23] : memref<1x1x4x1xf32, #tpu.memory_space<vmem>>, vector<1x1x4x1xf32>
      %46 = vector.shape_cast %45 : vector<1x1x4x1xf32> to vector<4x1xf32>
      %47 = vector.shape_cast %44 : vector<4x1xf32> to vector<1x1x4x1xf32>
      tpu.vector_store %arg5[%c0_20, %c0_21, %c0_22, %c0_23], %47 {strides = array<i32>} : memref<1x1x4x1xf32, #tpu.memory_space<vmem>>, vector<1x1x4x1xf32>,
      %c0_24 = arith.constant 0 : index
      %c0_25 = arith.constant 0 : index
      %c0_26 = arith.constant 0 : index
      %c0_27 = arith.constant 0 : index
      %48 = vector.load %arg6[%c0_24, %c0_25, %c0_26, %c0_27] : memref<1x1x4x1xf32, #tpu.memory_space<vmem>>, vector<1x1x4x1xf32>
      %49 = vector.shape_cast %48 : vector<1x1x4x1xf32> to vector<4x1xf32>
      %50 = arith.addf %49, %36 : vector<4x1xf32>
      %c0_28 = arith.constant 0 : index
      %c0_29 = arith.constant 0 : index
      %c0_30 = arith.constant 0 : index
      %c0_31 = arith.constant 0 : index
      %51 = vector.load %arg6[%c0_28, %c0_29, %c0_30, %c0_31] : memref<1x1x4x1xf32, #tpu.memory_space<vmem>>, vector<1x1x4x1xf32>
      %52 = vector.shape_cast %51 : vector<1x1x4x1xf32> to vector<4x1xf32>
      %53 = vector.shape_cast %50 : vector<4x1xf32> to vector<1x1x4x1xf32>
      tpu.vector_store %arg6[%c0_28, %c0_29, %c0_30, %c0_31], %53 {strides = array<i32>} : memref<1x1x4x1xf32, #tpu.memory_space<vmem>>, vector<1x1x4x1xf32>,
      %c0_32 = arith.constant 0 : index
      %c0_33 = arith.constant 0 : index
      %c0_34 = arith.constant 0 : index
      %c0_35 = arith.constant 0 : index
      %54 = vector.load %arg7[%c0_32, %c0_33, %c0_34, %c0_35] : memref<1x1x4x1xf32, #tpu.memory_space<vmem>>, vector<1x1x4x1xf32>
      %55 = vector.shape_cast %54 : vector<1x1x4x1xf32> to vector<4x1xf32>
      %56 = arith.addf %55, %41 : vector<4x1xf32>
      %c0_36 = arith.constant 0 : index
      %c0_37 = arith.constant 0 : index
      %c0_38 = arith.constant 0 : index
      %c0_39 = arith.constant 0 : index
      %57 = vector.load %arg7[%c0_36, %c0_37, %c0_38, %c0_39] : memref<1x1x4x1xf32, #tpu.memory_space<vmem>>, vector<1x1x4x1xf32>
      %58 = vector.shape_cast %57 : vector<1x1x4x1xf32> to vector<4x1xf32>
      %59 = vector.shape_cast %56 : vector<4x1xf32> to vector<1x1x4x1xf32>
      tpu.vector_store %arg7[%c0_36, %c0_37, %c0_38, %c0_39], %59 {strides = array<i32>} : memref<1x1x4x1xf32, #tpu.memory_space<vmem>>, vector<1x1x4x1xf32>,
    } else {
    }
    return
  }
  func.func @transform_0(%arg0: i32, %arg1: i32, %arg2: i32) -> (i32, i32, i32) {
    %c2_i32 = arith.constant 2 : i32
    %0 = arith.muli %arg1, %c2_i32 : i32
    %1 = arith.addi %0, %arg2 : i32
    %c3_i32 = arith.constant 3 : i32
    %2 = arith.minsi %1, %c3_i32 : i32
    %c0_i32 = arith.constant 0 : i32
    %c0_i32_0 = arith.constant 0 : i32
    return %arg0, %c0_i32, %2 : i32, i32, i32
  }
  func.func @transform_1(%arg0: i32, %arg1: i32, %arg2: i32) -> (i32, i32, i32) {
    %c2_i32 = arith.constant 2 : i32
    %0 = arith.muli %arg1, %c2_i32 : i32
    %1 = arith.addi %0, %arg2 : i32
    %c3_i32 = arith.constant 3 : i32
    %2 = arith.minsi %1, %c3_i32 : i32
    %c0_i32 = arith.constant 0 : i32
    %c0_i32_0 = arith.constant 0 : i32
    return %arg0, %c0_i32, %2 : i32, i32, i32
  }
  func.func @transform_2(%arg0: i32, %arg1: i32, %arg2: i32) -> (i32, i32, i32, i32) {
    %c0_i32 = arith.constant 0 : i32
    %c0_i32_0 = arith.constant 0 : i32
    %c0_i32_1 = arith.constant 0 : i32
    return %arg0, %arg1, %c0_i32, %c0_i32_0 : i32, i32, i32, i32
  }
  func.func @transform_3(%arg0: i32, %arg1: i32, %arg2: i32) -> (i32, i32, i32, i32) {
    %c0_i32 = arith.constant 0 : i32
    %c0_i32_0 = arith.constant 0 : i32
    %c0_i32_1 = arith.constant 0 : i32
    return %arg0, %arg1, %c0_i32, %c0_i32_0 : i32, i32, i32, i32
  }
  func.func @transform_4(%arg0: i32, %arg1: i32, %arg2: i32) -> (i32, i32, i32, i32) {
    %c0_i32 = arith.constant 0 : i32
    %c0_i32_0 = arith.constant 0 : i32
    %c0_i32_1 = arith.constant 0 : i32
    return %arg0, %arg1, %c0_i32, %c0_i32_0 : i32, i32, i32, i32
  }
}

</mosaic_0001>

<bundles_post_ra>
// kernel: tpu_custom_call.1
= control target key start
LH: loop header
LB: loop body
LE: loop exit
PB: predicated region body
PF: predicated region fallthrough
CT: control target
= control target key end

     0   :  { %10 = vsyncpa [#allocation3], 0  ;;  %s1809_s0 = inlined_call_operand.hbm [shape: f32[2,4,4096], index: 0, kind: input, shape index: {}]   ;;  %s1810_s1 = inlined_call_operand.hbm [shape: s32[2,1,4096], index: 1, kind: input, shape index: {}]   ;;  %s1811_s2 = inlined_call_operand.vmem [shape: f32[2,2,4,1], index: 2, kind: output, shape index: {0}]   ;;  %s1812_s3 = inlined_call_operand.vmem [shape: f32[2,2,4,1], index: 3, kind: output, shape index: {1}]   ;;  %s1813_s4 = inlined_call_operand.vmem [shape: f32[2,2,4,1], index: 4, kind: output, shape index: {2}]  }
   0x1   :  { %12 = vsyncpa [#allocation3 + $0x1], 0 }
   0x2   :  { %13 = vsyncpa [#allocation5], 0 }
   0x3   :  { %15 = vsyncpa [#allocation5 + $0x1], 0  ;;  %s1271_s15 = smov 0   ;;  %s1273_s16 = smov 0  }
   0x4   :  { %s1275_s17 = smov 0   ;;  %s1277_s18 = smov 0  }
   0x5   :  { %s1279_s19 = smov 0   ;;  %s1281_s20 = smov 0  }
   0x6   :  { %s1283_s21 = smov 0   ;;  %s1285_s22 = smov 0  }
   0x7   :  { %s1287_s23 = smov 0   ;;  %s1289_s24 = smov 0  }
   0x8 LB: > { %s964_s25 = sadd.s32 4294967295, %s1239_s24   ;;  %s33_s26 = sadd.s32 1, %s1227_s21  ;;  %s1239_s24 = sphi %s1289_s24, %s21_s24   ;;  %s1235_s23 = sphi %s1287_s23, %s1856_s23   ;;  %s1231_s22 = sphi %s1285_s22, %s1855_s22   ;;  %s1227_s21 = sphi %s1283_s21, %s1854_s21   ;;  %s1223_s20 = sphi %s1281_s20, %s1853_s20   ;;  %s1219_s19 = sphi %s1279_s19, %s1852_s19   ;;  %s1215_s18 = sphi %s1277_s18, %s1851_s18   ;;  %s1211_s17 = sphi %s1275_s17, %s1850_s17   ;;  %s1207_s16 = sphi %s1273_s16, %s1849_s16   ;;  %s1203_s15 = sphi %s1271_s15, %s1848_s15  }
   0x9   : > { %p34_p0 = scmp.ge.s32.totalorder %s33_s26, 2  ;;  %s36_s27 = sadd.s32 1, %s1231_s22 }
   0xa   : > { %s40_s28 = sadd.s32 1, %s1235_s23  ;;  %s966_s29 = sshll.u32 %s1231_s22, 1 }
   0xb   : > { %s1858_s26 = smov (%p34_p0, %s33_s26), 0  ;;  %s1860_s27 = smov (!%p34_p0, %s36_s27), %s1231_s22 }
   0xc   : > { %1818 = sst [smem:[#allocation8_spill]] %s1858_s26  ;;  %s45_s30 = sadd.s32 %s1227_s21, %s966_s29 }
   0xd   : > { %s57_s5 = sadd.s32 1, %s1211_s17  ;;  %p38_p1 = scmp.ge.s32.totalorder %s1860_s27, 2 }
   0xe   : > { %p46_p2 = scmp.lt.s32.totalorder %s45_s30, 3  ;;  %p64_p3 = scmp.ne.s32.totalorder %s1211_s17, %s1207_s16 }
   0xf   : > { %p65_p4 = scmp.eq.s32.totalorder %s1239_s24, 0  ;;  %s1862_s27 = smov (%p38_p1, %s1860_s27), 0 }
  0x10   : > { %1819 = sst [smem:[#allocation9_spill]] %s1862_s27  ;;  %s1864_s28 = smov (!%p38_p1, %s40_s28), %s1235_s23 }
  0x11   : > { %s1866_s30 = smov (!%p46_p2, %s45_s30), 3  ;;  %p42_p5 = scmp.ge.s32.totalorder %s1864_s28, 2 }
  0x12   : > { %s967_s6 = sshll.u32 %s1862_s27, 1  ;;  %p1339_p6 = por %p65_p4, %p64_p3 }
  0x13   : > { %s49_s7 = sadd.s32 %s967_s6, %s1858_s26  ;;  %s1868_s28 = smov (%p42_p5, %s1864_s28), 0 }
  0x14   : > { %1821 = sst [smem:[#allocation10_spill]] %s1868_s28  ;;  %p50_p7 = scmp.lt.s32.totalorder %s49_s7, 3 }
  0x15   : > { %p70_p8 = scmp.ne.s32.totalorder %s1207_s16, %s1203_s15  ;;  %s52_s9 = ssub.s32 %s1235_s23, %s1868_s28 }
  0x16   : > { %p71_p9 = scmp.eq.s32.totalorder %s964_s25, 0  ;;  %s1870_s7 = smov (!%p50_p7, %s49_s7), 3 }
  0x17   : > { %s53_s11 = ssub.s32 %s1866_s30, %s1870_s7  ;;  %p1009_p11 = scmp.lt.s32.totalorder %s1239_s24, 8 }
  0x18   : > { %p1349_p10 = por %p71_p9, %p70_p8  ;;  %s54_s12 = sor.u32 %s53_s11, %s52_s9 }
  0x19   : > { %s1355_s13 = sand.u32 1, %s1211_s17   ;;  %p55_p12 = scmp.eq.s32.totalorder %s54_s12, 0 }
  0x1a   : > { %s1822_s10 = scalar_select %p1349_p10, 1, 0 }
  0x1b   : > { %s972_s14 = sshll.u32 %s1355_s13, 5  ;;  %s974_s15 = sshll.u32 %s1866_s30, 3 }
  0x1c   : > { %s1359_s25 = scalar_select %p55_p12, %s1211_s17, %s57_s5  }
  0x1d   : > { %s975_s29 = sshll.u32 %s1235_s23, 5  ;;  %s218_s28 = scalar_lea.vmem [#allocation2], %s972_s14 }
  0x1e   : > { %s1362_s6 = sadd.s32 %s975_s29, %s974_s15  ;;  %s232_s27 = sshll.u32 %s218_s28, 4  ;;  %s1365_s27 = int_to_ptr.vmem [resolvable:$true] %s232_s27 }
  0x1f   : > { %s976_s7 = sshll.u32 %s1362_s6, 6  ;;  %p1376_p13 = pnand %p1009_p11, %p1339_p6 }
  0x20   : > { %s1370_s11 = scalar_lea.hbm %s1809_s0, %s976_s7  ;;  %s215_s28 = scalar_lea.sflag [#allocation3], %s1355_s13 }
  0x21   : > { %s1093_s5 = scalar_lea.hbm %s1370_s11, 512  ;;  %p1095_p3 = pneg %p1376_p13 }
  0x22   : > { %p1094_p2 = scmp.ne.s32.totalorder %s1370_s11, %s1093_s5  ;;  %s1098_s12 = scalar_lea.hbm %s1809_s0, 4096 }
  0x23   : > { %p1099_p6 = scmp.lt.u32.totalorder %s1370_s11, %s1809_s0  ;;  %p1100_p7 = scmp.lt.u32.totalorder %s1098_s12, %s1093_s5 }
  0x24   : > { %p1096_p4 = pnand %p1095_p3, %p1094_p2  ;;  %p1102_p9 = scmp.lt.u32.totalorder %s1093_s5, %s1370_s11 }
  0x25   : > { %p1101_p8 = por %p1100_p7, %p1099_p6 }
  0x26   : > { %p1097_p5 = pneg %p1096_p4 }
  0x27   : > { %p1103_p11 = por %p1102_p9, %p1101_p8 }
  0x29   : > { %p1104_p12 = pnand %p1103_p11, %p1097_p5 }
  0x2b   : > { %1107 = shalt.err (!%p1104_p12)
}
  0x2c   : > { %s1108_s29 = scalar_lea.vmem %s1365_s27, 512  ;;  %s1241_s7 = smov [#allocation2]  }
  0x2d   : > { %p1109_p2 = scmp.ne.s32.totalorder %s1365_s27, %s1108_s29  ;;  %s1113_s9 = sshll.u32 %s1241_s7, 4  ;;  %s1114_s9 = int_to_ptr.vmem [resolvable:$false] %s1113_s9 }
  0x2e   : > { %s1115_s26 = scalar_lea.vmem %s1114_s9, 1024  ;;  %p1116_p1 = scmp.lt.s32.totalorder %s1365_s27, %s1114_s9 }
  0x2f   : > { %p1111_p4 = pnand %p1109_p2, %p1095_p3  ;;  %p1117_p6 = scmp.lt.s32.totalorder %s1115_s26, %s1108_s29 }
  0x31   : > { %p1112_p0 = pneg %p1111_p4  ;;  %p1118_p7 = por %p1117_p6, %p1116_p1 }
  0x33   : > { %p1119_p8 = pnand %p1118_p7, %p1112_p0 }
  0x35   : > { %1122 = shalt.err (!%p1119_p8)
}
  0x36   : > { %1005 = dma.hbm_to_vmem [thread:$0]  (!%p1376_p13), %s1370_s11, 512, %s1365_s27, %s215_s28  }
  0x37   : > { %p1824_p5 = scmp.lt.s32.totalorder %s1239_s24, 9  ;;  %p1825_p9 = scmp.ge.s32.totalorder %s1239_s24, 1 }
  0x38   : > { %s977_s8 = sshll.u32 %s1355_s13, 3  ;;  %s981_s12 = sshll.u32 %s1362_s6, 4 }
  0x39   : > { %p1412_p11 = pnand %p1825_p9, %p1824_p5  ;;  %s1421_s29 = scalar_lea.hbm %s1810_s1, %s981_s12 }
  0x3a   : > { %s243_s7 = scalar_lea.vmem [#allocation4], %s977_s8  ;;  %s240_s27 = scalar_lea.sflag [#allocation5], %s1355_s13 }
  0x3b   : > { %s1826_s5 = scalar_select %p1412_p11, 1, 0 }
  0x3c   : > { %s257_s9 = sshll.u32 %s243_s7, 4  ;;  %s1123_s11 = scalar_lea.hbm %s1421_s29, 128  ;;  %s258_s9 = int_to_ptr.vmem [resolvable:$true] %s257_s9 }
  0x3d   : > { %p1124_p0 = scmp.ne.s32.totalorder %s1421_s29, %s1123_s11  ;;  %s1128_s26 = scalar_lea.hbm %s1810_s1, 1024 }
  0x3e   : > { %p1129_p2 = scmp.lt.u32.totalorder %s1421_s29, %s1810_s1  ;;  %p1130_p4 = scmp.lt.u32.totalorder %s1128_s26, %s1123_s11 }
  0x3f   : > { %p1126_p1 = pnand %p1124_p0, %p1095_p3  ;;  %p1132_p7 = scmp.lt.u32.totalorder %s1123_s11, %s1421_s29 }
  0x40   : > { %p1131_p6 = por %p1130_p4, %p1129_p2 }
  0x41   : > { %p1127_p12 = pneg %p1126_p1 }
  0x42   : > { %p1133_p8 = por %p1132_p7, %p1131_p6 }
  0x44   : > { %p1134_p5 = pnand %p1133_p8, %p1127_p12 }
  0x46   : > { %1137 = shalt.err (!%p1134_p5)
}
  0x47   : > { %s1138_s13 = scalar_lea.vmem %s258_s9, 128  ;;  %s1242_s8 = smov [#allocation4]  }
  0x48   : > { %p1139_p9 = scmp.ne.s32.totalorder %s258_s9, %s1138_s13  ;;  %s1143_s15 = sshll.u32 %s1242_s8, 4  ;;  %s1144_s15 = int_to_ptr.vmem [resolvable:$false] %s1143_s15 }
  0x49   : > { %s1145_s7 = scalar_lea.vmem %s1144_s15, 256  ;;  %p1146_p10 = scmp.lt.s32.totalorder %s258_s9, %s1144_s15 }
  0x4a   : > { %p1141_p0 = pnand %p1139_p9, %p1095_p3  ;;  %p1147_p11 = scmp.lt.s32.totalorder %s1145_s7, %s1138_s13 }
  0x4c   : > { %p1142_p1 = pneg %p1141_p0  ;;  %p1148_p2 = por %p1147_p11, %p1146_p10 }
  0x4e   : > { %p1149_p4 = pnand %p1148_p2, %p1142_p1 }
  0x50   : > { %1152 = shalt.err (!%p1149_p4)
}
  0x51   : > { %1008 = dma.hbm_to_vmem [thread:$0]  (!%p1376_p13), %s1421_s29, 128, %s258_s9, %s240_s27  }
  0x52   : > { %p1827_p12 = scmp.ne.s32.totalorder %s1826_s5, 0 }
  0x53   : > { %s268_s11 = sand.u32 (!%p1827_p12), 1, %s1207_s16   ;;  %p1828_p3 = scmp.ne.s32.totalorder (!%p1827_p12), %s1822_s10, 0 }
  0x54   : > { %266 = sbr.rel (%p1827_p12) target bundleno = 475 (0x1db), region = 28  ;;  %s983_s6 = sshll.u32 (!%p1827_p12), %s268_s11, 5 }
  0x55   : > { %s269_s28 = scalar_lea.sflag (!%p1827_p12), [#allocation3], %s268_s11  ;;  %s1446_s26 = scalar_lea.vmem (!%p1827_p12), [#allocation2], %s983_s6 }
  0x5b   : > { %1194 = dma.done.wait (%p1828_p3), %s269_s28, 512  }
  0x5c   : > { %1196 = vsyncadd (%p1828_p3), %s269_s28, 4294966784  ;;  %s984_s12 = sshll.u32 %s268_s11, 3  ;;  %s278_s30 = scalar_lea.sflag [#allocation5], %s268_s11 }
  0x5d   : > { %s281_s14 = scalar_lea.vmem [#allocation4], %s984_s12 }
  0x5e   : > { %1198 = dma.done.wait (%p1828_p3), %s278_s30, 128  }
  0x5f   : > { %1200 = vsyncadd (%p1828_p3), %s278_s30, 4294967168  ;;  %p340_p10 = scmp.lt.s32.totalorder %s1223_s20, 1  ;;  %p342_p13 = scmp.lt.s32.totalorder %s1219_s19, 1 }
  0x60   : > { %p991_p11 = scmp.ne.s32.totalorder %s1215_s18, 0 }
  0x61   : > { %s1872_s20 = smov (!%p340_p10, %s1223_s20), 1  ;;  %vm368_vm0 = vcmask (!%p991_p11), 3072   ;;  %v1243_v0 = vmov (!%p991_p11), 0.0  }
  0x62   : > { %s343_s5 = scalar_select %p342_p13, %s1219_s19, 1 }
  0x63   : > { %s985_s29 = sshll.u32 %s1872_s20, 1  ;;  %367 = sbr.rel (%p991_p11) target bundleno = 106 (0x6a), region = 40 }
  0x64   : > { %s345_s9 = sadd.s32 %s985_s29, %s343_s5 }
  0x65   : > { %s986_s27 = sshll.u32 %s345_s9, 2 }
  0x66   : > { %s1463_s15 = scalar_lea.vmem %s1811_s2, %s986_s27  ;;  %s1468_s10 = scalar_lea.vmem %s1812_s3, %s986_s27 }
  0x67   : > { %s1473_s12 = scalar_lea.vmem %s1813_s4, %s986_s27  ;;  %369 = vst.msk [vmem:[%s1463_s15] sm:$0xf] (!%p991_p11), %vm368_vm0, %v1243_v0  ;;  %370 = vst.msk [vmem:[%s1468_s10] sm:$0xf] (!%p991_p11), %vm368_vm0, %v1243_v0 }
  0x68   : > { %371 = vst.msk [vmem:[%s1473_s12] sm:$0xf] (!%p991_p11), %vm368_vm0, %v1243_v0 }
  0x6a PF: > { %s992_s20 = sshll.u32 %s1219_s19, 1  ;;  %v1481_v1 = vld [vmem:[%s1446_s26] sm:$0xff]  ;;  %v1484_v2 = vld [vmem:[%s1446_s26 + $0x8] sm:$0xff]  ;;  %v1487_v3 = vld [vmem:[%s1446_s26 + $0x10] sm:$0xff] }
  0x6b   : > { %s1490_s30 = sadd.s32 %s1215_s18, %s992_s20  ;;  %v1493_v4 = vld [vmem:[%s1446_s26 + $0x18] sm:$0xff]  ;;  %v1495_v5 = vld [vmem:[%s281_s14] sm:$0xff] }
  0x6c   : > { %s993_s5 = sshll.u32 %s1490_s30, 10 }
  0x6d   : > { %s1500_s29 = sadd.s32 1024, %s993_s5 }
  0x6e   : > { %p994_p6 = scmp.gt.s32.totalorder %s1500_s29, 4096 }
  0x6f   : > { %v385_v6 = vlaneseq (!%p994_p6)  ;;  %v431_v8 = vcombine.high (!%p994_p6), %v1481_v1, %v1481_v1  ;;  %v432_v9 = vcombine.high (!%p994_p6), %v1484_v2, %v1484_v2  ;;  %v1518_v17 = vcombine.high (!%p994_p6), %v1487_v3, %v1487_v3 }
  0x70   : > { %384 = sbr.rel (%p994_p6) target bundleno = 285 (0x11d), region = 44  ;;  %vm447_vm1 = vcmask (!%p994_p6), 1043456   ;;  %v1534_v26 = vcombine.high (!%p994_p6), %v1493_v4, %v1493_v4  ;;  %v1244_v42 = vmov (!%p994_p6), 0.0   ;;  %vm509_vm10 = vcmask (!%p994_p6), 3072  }
  0x71   : > { %v1503_v7 = vshrl.u32 (!%p994_p6), %v385_v6, 7  ;;  %v465_v27 = vsel (!%p994_p6), %vm447_vm1, %v1481_v1, 0.0  ;;  %v466_v28 = vsel (!%p994_p6), %vm447_vm1, %v431_v8, 0.0  ;;  %v468_v34 = vsel (!%p994_p6), %vm447_vm1, %v1484_v2, 0.0 }
  0x72   : > { %v467_v40 = vadd.f32 (!%p994_p6), %v466_v28, %v465_v27  ;;  %v470_v60 = vsel (!%p994_p6), %vm447_vm1, %v432_v9, 0.0 }
  0x73   : > { %v389_v10 = vsub.s32 (!%p994_p6), 0, %v1503_v7  ;;  %v393_v11 = vsub.s32 (!%p994_p6), 1, %v1503_v7  ;;  %v397_v12 = vsub.s32 (!%p994_p6), 2, %v1503_v7  ;;  %v401_v13 = vsub.s32 (!%p994_p6), 3, %v1503_v7 }
  0x74   : > { %v405_v14 = vsub.s32 (!%p994_p6), 4, %v1503_v7  ;;  %v409_v15 = vsub.s32 (!%p994_p6), 5, %v1503_v7  ;;  %v413_v16 = vsub.s32 (!%p994_p6), 6, %v1503_v7  ;;  %v417_v24 = vsub.s32 (!%p994_p6), 7, %v1503_v7 }
  0x75   : > { %v390_v18 = vrot.slane (!%p994_p6), %v1495_v5, %v389_v10  ;;  %v394_v19 = vrot.slane (!%p994_p6), %v1495_v5, %v393_v11  ;;  %v398_v20 = vrot.slane (!%p994_p6), %v1495_v5, %v397_v12  ;;  %v402_v21 = vrot.slane (!%p994_p6), %v1495_v5, %v401_v13 }
  0x76   : > { %v406_v22 = vrot.slane (!%p994_p6), %v1495_v5, %v405_v14  ;;  %v410_v23 = vrot.slane (!%p994_p6), %v1495_v5, %v409_v15  ;;  %v414_v25 = vrot.slane (!%p994_p6), %v1495_v5, %v413_v16  ;;  %v418_v32 = vrot.slane (!%p994_p6), %v1495_v5, %v417_v24 }
  0x77   : > { %vm419_vm2 = vcmp.eq.s32.totalorder %v390_v18, %v1503_v7  ;;  %vm420_vm3 = vcmp.eq.s32.totalorder %v394_v19, %v1503_v7  ;;  %vm421_vm4 = vcmp.eq.s32.totalorder %v398_v20, %v1503_v7  ;;  %vm422_vm5 = vcmp.eq.s32.totalorder %v402_v21, %v1503_v7 }
  0x78   : > { %vm423_vm6 = vcmp.eq.s32.totalorder %v406_v22, %v1503_v7  ;;  %v439_v29 = vsel %vm419_vm2, %v1481_v1, 0.0  ;;  %v440_v30 = vsel %vm420_vm3, %v431_v8, 0.0  ;;  %v441_v31 = vsel %vm421_vm4, %v1484_v2, 0.0 }
  0x79   : > { %v442_v33 = vsel %vm422_vm5, %v432_v9, 0.0  ;;  %vm424_vm7 = vcmp.eq.s32.totalorder %v410_v23, %v1503_v7  ;;  %v448_v35 = vsel %vm447_vm1, %v439_v29, 0.0  ;;  %v449_v36 = vsel %vm447_vm1, %v440_v30, 0.0 }
  0x7a   : > { %v451_v37 = vsel %vm447_vm1, %v441_v31, 0.0  ;;  %vm425_vm8 = vcmp.eq.s32.totalorder %v414_v25, %v1503_v7  ;;  %v443_v38 = vsel %vm423_vm6, %v1487_v3, 0.0  ;;  %v450_v39 = vadd.f32 %v449_v36, %v448_v35  ;;  %v514_v35 = vld [vmem:[%s1473_s12] sm:$0xf] }
  0x7b   : > { %v453_v41 = vsel %vm447_vm1, %v442_v33, 0.0  ;;  %v482_v43 = vsel %vm419_vm2, 1.0, %v1244_v42  ;;  %v483_v44 = vsel %vm420_vm3, 1.0, %v1244_v42  ;;  %v484_v45 = vsel %vm421_vm4, 1.0, %v1244_v42  ;;  %v511_v36 = vld [vmem:[%s1468_s10] sm:$0xf] }
  0x7c   : > { %vm426_vm9 = vcmp.eq.s32.totalorder %v418_v32, %v1503_v7  ;;  %v444_v46 = vsel %vm424_vm7, %v1518_v17, 0.0  ;;  %v452_v47 = vadd.f32 %v451_v37, %v450_v39  ;;  %v485_v48 = vsel %vm422_vm5, 1.0, %v1244_v42  ;;  %v507_v32 = vld [vmem:[%s1463_s15] sm:$0xf] }
  0x7d   : > { %v445_v49 = vsel %vm425_vm8, %v1493_v4, 0.0  ;;  %v455_v50 = vsel %vm447_vm1, %v443_v38, 0.0  ;;  %v490_v51 = vsel %vm447_vm1, %v482_v43, 0.0  ;;  %v491_v52 = vsel %vm447_vm1, %v483_v44, 0.0 }
  0x7e   : > { %v454_v53 = vadd.f32 %v453_v41, %v452_v47  ;;  %v486_v54 = vsel %vm423_vm6, 1.0, %v1244_v42  ;;  %v492_v55 = vadd.f32 %v491_v52, %v490_v51  ;;  %v493_v56 = vsel %vm447_vm1, %v484_v45, 0.0 }
  0x7f   : > { %v446_v57 = vsel %vm426_vm9, %v1534_v26, 0.0  ;;  %v457_v58 = vsel %vm447_vm1, %v444_v46, 0.0  ;;  %v495_v59 = vsel %vm447_vm1, %v485_v48, 0.0  ;;  %v487_v62 = vsel %vm424_vm7, 1.0, %v1244_v42 }
  0x80   : > { %v456_v61 = vadd.f32 %v455_v50, %v454_v53  ;;  %v494_v63 = vadd.f32 %v493_v56, %v492_v55  ;;  %v469_v0 = vadd.f32 %v468_v34, %v467_v40  ;;  %v459_v6 = vsel %vm447_vm1, %v445_v49, 0.0 }
  0x81   : > { %v497_v8 = vsel %vm447_vm1, %v486_v54, 0.0  ;;  %v472_v10 = vsel %vm447_vm1, %v1487_v3, 0.0  ;;  %v488_v12 = vsel %vm425_vm8, 1.0, %v1244_v42  ;;  %v461_v9 = vsel %vm447_vm1, %v446_v57, 0.0 }
  0x82   : > { %v458_v11 = vadd.f32 %v457_v58, %v456_v61  ;;  %v496_v13 = vadd.f32 %v495_v59, %v494_v63  ;;  %v471_v14 = vadd.f32 %v470_v60, %v469_v0  ;;  %v499_v15 = vsel %vm447_vm1, %v487_v62, 0.0 }
  0x83   : > { %v474_v16 = vsel %vm447_vm1, %v1518_v17, 0.0  ;;  %v489_v19 = vsel %vm426_vm9, 1.0, %v1244_v42  ;;  %v501_v22 = vsel %vm447_vm1, %v488_v12, 0.0  ;;  %v476_v23 = vsel %vm447_vm1, %v1493_v4, 0.0 }
  0x84   : > { %v460_v18 = vadd.f32 %v459_v6, %v458_v11  ;;  %v498_v20 = vadd.f32 %v497_v8, %v496_v13  ;;  %v473_v21 = vadd.f32 %v472_v10, %v471_v14  ;;  %v503_v17 = vsel %vm447_vm1, %v489_v19, 0.0 }
  0x85   : > { %v478_v7 = vsel %vm447_vm1, %v1534_v26, 0.0 }
  0x86   : > { %v462_v24 = vadd.f32 %v461_v9, %v460_v18  ;;  %v500_v25 = vadd.f32 %v499_v15, %v498_v20  ;;  %v475_v27 = vadd.f32 %v474_v16, %v473_v21 }
  0x88   : > { %463 = vadd.xlane.f32.xlu0 %v462_v24  ;;  %v502_v28 = vadd.f32 %v501_v22, %v500_v25  ;;  %v477_v29 = vadd.f32 %v476_v23, %v475_v27 }
  0x8a   : > { %v504_v30 = vadd.f32 %v503_v17, %v502_v28  ;;  %v479_v31 = vadd.f32 %v478_v7, %v477_v29 }
  0x8c   : > { %505 = vadd.xlane.f32.xlu1 %v504_v30  ;;  %480 = vadd.xlane.f32.xlu0 %v479_v31 }
 0x115   : > { %v464_v33 = vpop.xlane.xlu0 %463 }
 0x116   : > { %v508_v34 = vadd.f32 %v507_v32, %v464_v33 }
 0x118   : > { %510 = vst.msk [vmem:[%s1463_s15] sm:$0xf] %vm509_vm10, %v508_v34 }
 0x119   : > { %v506_v37 = vpop.xlane.xlu1 %505  ;;  %v481_v38 = vpop.xlane.xlu0 %480 }
 0x11a   : > { %v515_v39 = vadd.f32 %v514_v35, %v506_v37  ;;  %v512_v26 = vadd.f32 %v511_v36, %v481_v38 }
 0x11c   : > { %516 = vst.msk [vmem:[%s1473_s12] sm:$0xf] %vm509_vm10, %v515_v39  ;;  %513 = vst.msk [vmem:[%s1468_s10] sm:$0xf] %vm509_vm10, %v512_v26 }
 0x11d PF: > { %p995_p7 = scmp.le.s32.totalorder %s1500_s29, 4096 }
 0x11e   : > { %v521_v40 = vlaneseq (!%p995_p7)  ;;  %v530_v42 = vstv (!%p995_p7), %s993_s5  ;;  %v567_v43 = vcombine.high (!%p995_p7), %v1481_v1, %v1481_v1  ;;  %v568_v60 = vcombine.high (!%p995_p7), %v1484_v2, %v1484_v2 }
 0x11f   : > { %520 = sbr.rel (%p995_p7) target bundleno = 475 (0x1db), region = 48  ;;  %v569_v61 = vcombine.high (!%p995_p7), %v1487_v3, %v1487_v3  ;;  %vm673_vm3 = vcmask (!%p995_p7), 1043456   ;;  %v570_v26 = vcombine.high (!%p995_p7), %v1493_v4, %v1493_v4 }
 0x120   : > { %v522_v41 = vand.u32 (!%p995_p7), 127, %v521_v40  ;;  %v1622_v59 = vshrl.u32 (!%p995_p7), %v521_v40, 7 }
 0x122   : > { %v523_v44 = vadd.s32 (!%p995_p7), 128, %v522_v41  ;;  %v524_v45 = vadd.s32 (!%p995_p7), 256, %v522_v41  ;;  %v525_v46 = vadd.s32 (!%p995_p7), 384, %v522_v41  ;;  %v526_v47 = vadd.s32 (!%p995_p7), 512, %v522_v41 }
 0x123   : > { %v527_v48 = vadd.s32 (!%p995_p7), 640, %v522_v41  ;;  %v528_v49 = vadd.s32 (!%p995_p7), 768, %v522_v41  ;;  %v529_v50 = vadd.s32 (!%p995_p7), 896, %v522_v41  ;;  %v531_v51 = vadd.s32 (!%p995_p7), %v530_v42, %v522_v41 }
 0x124   : > { %v532_v52 = vadd.s32 (!%p995_p7), %v530_v42, %v523_v44  ;;  %v533_v53 = vadd.s32 (!%p995_p7), %v530_v42, %v524_v45  ;;  %v534_v54 = vadd.s32 (!%p995_p7), %v530_v42, %v525_v46  ;;  %v535_v55 = vadd.s32 (!%p995_p7), %v530_v42, %v526_v47 }
 0x125   : > { %v536_v56 = vadd.s32 (!%p995_p7), %v530_v42, %v527_v48  ;;  %v537_v57 = vadd.s32 (!%p995_p7), %v530_v42, %v528_v49  ;;  %v1620_v58 = vadd.s32 (!%p995_p7), %v530_v42, %v529_v50  ;;  %vm539_vm11 = vcmp.lt.s32.totalorder (!%p995_p7), %v531_v51, 4096  ;;  %v740_v50 = vld [vmem:[%s1473_s12] sm:$0xf] (!%p995_p7) }
 0x126   : > { %vm540_vm12 = vcmp.lt.s32.totalorder %v532_v52, 4096  ;;  %vm541_vm13 = vcmp.lt.s32.totalorder %v533_v53, 4096  ;;  %vm542_vm14 = vcmp.lt.s32.totalorder %v534_v54, 4096  ;;  %vm543_vm15 = vcmp.lt.s32.totalorder %v535_v55, 4096 }
 0x127   : > { %vm544_vm0 = vcmp.lt.s32.totalorder %v536_v56, 4096  ;;  %vm545_vm1 = vcmp.lt.s32.totalorder %v537_v57, 4096  ;;  %vm546_vm2 = vcmp.lt.s32.totalorder %v1620_v58, 4096  ;;  %v1631_v62 = vsel %vm539_vm11, %v1481_v1, 0.0 }
 0x128   : > { %v1634_v63 = vsel %vm540_vm12, %v567_v43, 0.0  ;;  %v585_v0 = vsub.s32 0, %v1622_v59  ;;  %v589_v6 = vsub.s32 1, %v1622_v59  ;;  %v593_v8 = vsub.s32 2, %v1622_v59 }
 0x129   : > { %v597_v10 = vsub.s32 3, %v1622_v59  ;;  %v601_v11 = vsub.s32 4, %v1622_v59  ;;  %v605_v13 = vsub.s32 5, %v1622_v59  ;;  %v609_v1 = vsub.s32 6, %v1622_v59 }
 0x12a   : > { %v586_v12 = vrot.slane %v1495_v5, %v585_v0  ;;  %v613_v14 = vsub.s32 7, %v1622_v59  ;;  %v590_v9 = vrot.slane %v1495_v5, %v589_v6  ;;  %v594_v15 = vrot.slane %v1495_v5, %v593_v8 }
 0x12b   : > { %v598_v16 = vrot.slane %v1495_v5, %v597_v10  ;;  %v602_v18 = vrot.slane %v1495_v5, %v601_v11  ;;  %v606_v19 = vrot.slane %v1495_v5, %v605_v13  ;;  %v610_v20 = vrot.slane %v1495_v5, %v609_v1 }
 0x12c   : > { %v614_v21 = vrot.slane %v1495_v5, %v613_v14  ;;  %v615_v22 = vsel %vm539_vm11, %v586_v12, 4  ;;  %v616_v23 = vsel %vm540_vm12, %v590_v9, 4  ;;  %v617_v24 = vsel %vm541_vm13, %v594_v15, 4 }
 0x12d   : > { %v618_v25 = vsel %vm542_vm14, %v598_v16, 4  ;;  %v619_v27 = vsel %vm543_vm15, %v602_v18, 4  ;;  %v620_v17 = vsel %vm544_vm0, %v606_v19, 4  ;;  %v621_v7 = vsel %vm545_vm1, %v610_v20, 4 }
 0x12e   : > { %v622_v28 = vsel %vm546_vm2, %v614_v21, 4  ;;  %v628_v29 = vrot.slane %v615_v22, %v585_v0  ;;  %v632_v30 = vrot.slane %v616_v23, %v585_v0  ;;  %v636_v5 = vrot.slane %v617_v24, %v585_v0 }
 0x12f   : > { %v640_v31 = vrot.slane %v618_v25, %v585_v0  ;;  %v644_v32 = vrot.slane %v619_v27, %v585_v0  ;;  %v577_v33 = vsel %vm541_vm13, %v1484_v2, 0.0  ;;  %v578_v34 = vsel %vm542_vm14, %v568_v60, 0.0 }
 0x130   : > { %v648_v35 = vrot.slane %v620_v17, %v585_v0  ;;  %vm1665_vm4 = vcmp.eq.s32.totalorder %v628_v29, %v1622_v59  ;;  %v652_v37 = vrot.slane %v621_v7, %v585_v0  ;;  %vm1670_vm5 = vcmp.eq.s32.totalorder %v632_v30, %v1622_v59 }
 0x131   : > { %vm1675_vm6 = vcmp.eq.s32.totalorder %v636_v5, %v1622_v59  ;;  %vm1680_vm7 = vcmp.eq.s32.totalorder %v640_v31, %v1622_v59  ;;  %v656_v40 = vrot.slane %v622_v28, %v585_v0  ;;  %v665_v41 = vsel %vm1665_vm4, %v1631_v62, 0.0 }
 0x132   : > { %v579_v42 = vsel %vm543_vm15, %v1487_v3, 0.0  ;;  %vm1692_vm8 = vcmp.eq.s32.totalorder %v644_v32, %v1622_v59  ;;  %v666_v44 = vsel %vm1670_vm5, %v1634_v63, 0.0  ;;  %v667_v45 = vsel %vm1675_vm6, %v577_v33, 0.0 }
 0x133   : > { %v580_v46 = vsel %vm544_vm0, %v569_v61, 0.0  ;;  %v581_v47 = vsel %vm545_vm1, %v1493_v4, 0.0  ;;  %v668_v3 = vsel %vm1680_vm7, %v578_v34, 0.0  ;;  %v674_v48 = vsel %vm673_vm3, %v665_v41, 0.0 }
 0x134   : > { %vm1708_vm9 = vcmp.eq.s32.totalorder %v648_v35, %v1622_v59  ;;  %vm1713_vm10 = vcmp.eq.s32.totalorder %v652_v37, %v1622_v59  ;;  %v675_v51 = vsel %vm673_vm3, %v666_v44, 0.0  ;;  %v677_v52 = vsel %vm673_vm3, %v667_v45, 0.0 }
 0x135   : > { %v582_v4 = vsel %vm546_vm2, %v570_v26, 0.0  ;;  %vm1722_vm11 = vcmp.eq.s32.totalorder %v656_v40, %v1622_v59  ;;  %v669_v54 = vsel %vm1692_vm8, %v579_v42, 0.0  ;;  %v676_v55 = vadd.f32 %v675_v51, %v674_v48 }
 0x136   : > { %v679_v56 = vsel %vm673_vm3, %v668_v3, 0.0  ;;  %v1245_v57 = vmov 0.0   ;;  %v670_v59 = vsel %vm1708_vm9, %v580_v46, 0.0  ;;  %v671_v0 = vsel %vm1713_vm10, %v581_v47, 0.0 }
 0x137   : > { %v708_v60 = vsel %vm1665_vm4, 1.0, %v1245_v57  ;;  %v709_v61 = vsel %vm1670_vm5, 1.0, %v1245_v57  ;;  %v710_v58 = vsel %vm1675_vm6, 1.0, %v1245_v57  ;;  %v678_v6 = vadd.f32 %v677_v52, %v676_v55 }
 0x138   : > { %v711_v8 = vsel %vm1680_vm7, 1.0, %v1245_v57  ;;  %v681_v10 = vsel %vm673_vm3, %v669_v54, 0.0  ;;  %v716_v11 = vsel %vm673_vm3, %v708_v60, 0.0  ;;  %v717_v12 = vsel %vm673_vm3, %v709_v61, 0.0 }
 0x139   : > { %v719_v13 = vsel %vm673_vm3, %v710_v58, 0.0  ;;  %v672_v1 = vsel %vm1722_vm11, %v582_v4, 0.0  ;;  %v680_v14 = vadd.f32 %v679_v56, %v678_v6  ;;  %v712_v9 = vsel %vm1692_vm8, 1.0, %v1245_v57 }
 0x13a   : > { %v718_v15 = vadd.f32 %v717_v12, %v716_v11  ;;  %v683_v16 = vsel %vm673_vm3, %v670_v59, 0.0  ;;  %v713_v18 = vsel %vm1708_vm9, 1.0, %v1245_v57  ;;  %v721_v19 = vsel %vm673_vm3, %v711_v8, 0.0 }
 0x13b   : > { %v691_v20 = vsel %vm673_vm3, %v1631_v62, 0.0  ;;  %v682_v21 = vadd.f32 %v681_v10, %v680_v14  ;;  %v692_v23 = vsel %vm673_vm3, %v1634_v63, 0.0  ;;  %v694_v24 = vsel %vm673_vm3, %v577_v33, 0.0 }
 0x13c   : > { %v720_v22 = vadd.f32 %v719_v13, %v718_v15  ;;  %v685_v25 = vsel %vm673_vm3, %v671_v0, 0.0  ;;  %v723_v27 = vsel %vm673_vm3, %v712_v9, 0.0  ;;  %v693_v17 = vadd.f32 %v692_v23, %v691_v20 }
 0x13d   : > { %v684_v7 = vadd.f32 %v683_v16, %v682_v21  ;;  %v714_v28 = vsel %vm1713_vm10, 1.0, %v1245_v57  ;;  %v696_v30 = vsel %vm673_vm3, %v578_v34, 0.0  ;;  %v687_v62 = vsel %vm673_vm3, %v672_v1, 0.0 }
 0x13e   : > { %v722_v29 = vadd.f32 %v721_v19, %v720_v22  ;;  %v725_v5 = vsel %vm673_vm3, %v713_v18, 0.0  ;;  %v695_v31 = vadd.f32 %v694_v24, %v693_v17  ;;  %v715_v32 = vsel %vm1722_vm11, 1.0, %v1245_v57 }
 0x13f   : > { %v686_v63 = vadd.f32 %v685_v25, %v684_v7  ;;  %v698_v35 = vsel %vm673_vm3, %v579_v42, 0.0  ;;  %v727_v36 = vsel %vm673_vm3, %v714_v28, 0.0  ;;  %v700_v34 = vsel %vm673_vm3, %v580_v46, 0.0  ;;  %v733_v46 = vld [vmem:[%s1463_s15] sm:$0xf] }
 0x140   : > { %v724_v33 = vadd.f32 %v723_v27, %v722_v29  ;;  %v697_v37 = vadd.f32 %v696_v30, %v695_v31  ;;  %v729_v2 = vsel %vm673_vm3, %v715_v32, 0.0  ;;  %v702_v41 = vsel %vm673_vm3, %v581_v47, 0.0  ;;  %v737_v47 = vld [vmem:[%s1468_s10] sm:$0xf] }
 0x141   : > { %v688_v38 = vadd.f32 %v687_v62, %v686_v63  ;;  %v704_v44 = vsel %vm673_vm3, %v582_v4, 0.0  ;;  %vm735_vm12 = vcmask 3072  }
 0x142   : > { %v726_v39 = vadd.f32 %v725_v5, %v724_v33  ;;  %v699_v26 = vadd.f32 %v698_v35, %v697_v37 }
 0x143   : > { %689 = vadd.xlane.f32.xlu0 %v688_v38 }
 0x144   : > { %v728_v40 = vadd.f32 %v727_v36, %v726_v39  ;;  %v701_v43 = vadd.f32 %v700_v34, %v699_v26 }
 0x146   : > { %v730_v42 = vadd.f32 %v729_v2, %v728_v40  ;;  %v703_v45 = vadd.f32 %v702_v41, %v701_v43 }
 0x148   : > { %731 = vadd.xlane.f32.xlu1 %v730_v42  ;;  %v705_v3 = vadd.f32 %v704_v44, %v703_v45 }
 0x14a   : > { %706 = vadd.xlane.f32.xlu0 %v705_v3 }
 0x1d0   : > { %v690_v48 = vpop.xlane.xlu0 %689 }
 0x1d1   : > { %v734_v49 = vadd.f32 %v733_v46, %v690_v48 }
 0x1d3   : > { %736 = vst.msk [vmem:[%s1463_s15] sm:$0xf] %vm735_vm12, %v734_v49 }
 0x1d5   : > { %v732_v51 = vpop.xlane.xlu1 %731 }
 0x1d6   : > { %v741_v52 = vadd.f32 %v740_v50, %v732_v51 }
 0x1d7   : > { %v707_v53 = vpop.xlane.xlu0 %706 }
 0x1d8   : > { %742 = vst.msk [vmem:[%s1473_s12] sm:$0xf] %vm735_vm12, %v741_v52  ;;  %v738_v54 = vadd.f32 %v737_v47, %v707_v53 }
 0x1da   : > { %739 = vst.msk [vmem:[%s1468_s10] sm:$0xf] %vm735_vm12, %v738_v54 }
 0x1db PF: > { %s21_s24 = sadd.s32 1, %s1239_s24   ;;  %s1845_s26 = sld [smem:[#allocation8_spill]] }
 0x1dc   : > { %p18_p8 = scmp.ge.s32.totalorder %s21_s24, 10   ;;  %s1846_s14 = sld [smem:[#allocation9_spill]] }
 0x1dd   : > { %s1847_s9 = sld [smem:[#allocation10_spill]]  ;;  %s1848_s15 = smov %s1207_s16 }
 0x1de   : > { %s1849_s16 = smov %s1211_s17  ;;  %s1850_s17 = smov %s1359_s25 }
 0x1df   : > { %s1851_s18 = smov %s1227_s21  ;;  %s1852_s19 = smov %s1231_s22 }
 0x1e0   : > { %s1853_s20 = smov %s1235_s23  ;;  %20 = sbr.rel (!%p18_p8) target bundleno = 8 (0x8), region = 117 }
 0x1e1   : > { %s1854_s21 = smov %s1845_s26 }
 0x1e2   : > { %s1855_s22 = smov %s1846_s14 }
 0x1e3   : > { %s1856_s23 = smov %s1847_s9 }
 0x1e7   :  { %814 = vsyncpa [#allocation3], 1 }
 0x1e8   :  { %816 = vsyncpa [#allocation3 + $0x1], 1 }
 0x1e9   :  { %817 = vsyncpa [#allocation5], 1 }
 0x1ea   :  { %819 = vsyncpa [#allocation5 + $0x1], 1 }

</bundles_post_ra>
